<compile_context>
chip_gen: v7x
topology: tpu7x:2x2x1
jax: 0.10.0
libtpu: 0.0.40
codegen_flags: <defaults>
</compile_context>

<pallas_src>
import math

import jax
import jax.numpy as jnp
import numpy as np
from jax import lax
from jax.experimental import pallas as pl
from jax.experimental.pallas import tpu as pltpu


def _round_up(x: int, m: int) -> int:
    return ((x + m - 1) // m) * m


def _embed_kernel(tok_ref, tab_ref, out_ref):
    """Gather one tile of embeddings via one bf16 one-hot MXU matmul per lane group.

    tok_ref : VMEM (rows, pack)       int32     -- pack tokens per output row
    tab_ref : VMEM (2*max_len, emb)   bfloat16  -- [hi; lo] split of the f32 table
    out_ref : VMEM (rows, pack*emb)             -- lane-dense output tile
    """
    tok = tok_ref[...]                       # (rows, pack) int32
    table = tab_ref[...]                     # (2*max_len, emb) bf16
    rows, pack = tok.shape
    two_max_len, emb = table.shape
    max_len = two_max_len // 2

    # One iota per tile (hoisted out of the pack loop), wrapped so positions k and
    # k+max_len are both hot for index k: the MXU then sums the hi and lo rows in
    # its f32 accumulator in a single pass.
    iota = lax.broadcasted_iota(jnp.int32, (rows, two_max_len), 1)
    iota = jnp.where(iota >= max_len, iota - max_len, iota)

    for p in range(pack):                    # small static unroll (pack = 128//emb)
        idx_p = tok[:, p:p + 1]                                   # (rows, 1)
        one_hot = (iota == idx_p).astype(jnp.bfloat16)            # cmp + cast only
        part = jnp.dot(one_hot, table, preferred_element_type=jnp.float32)
        out_ref[:, p * emb:(p + 1) * emb] = part.astype(out_ref.dtype)


def positional_encoding_lookup(tok, pe_weight, *, block_t: int = 1024):
    """Pallas equivalent of nn.Embedding(maxLen, embSize)(tok)."""
    tok = jnp.asarray(tok)
    max_len, emb_size = pe_weight.shape
    orig_shape = tok.shape
    t = int(math.prod(orig_shape)) if orig_shape else 1
    tok_flat = tok.reshape((t,)).astype(jnp.int32)

    # hi/lo bf16 split of the table, stacked along rows.  0/1 one-hots are exact in
    # bf16 and hi+lo reconstructs the f32 values to ~2^-16 relative error while
    # using only DEFAULT-precision bf16 MXU passes.
    w32 = pe_weight.astype(jnp.float32)
    hi = w32.astype(jnp.bfloat16)
    lo = (w32 - hi.astype(jnp.float32)).astype(jnp.bfloat16)
    table = jnp.concatenate([hi, lo], axis=0)                 # (2*max_len, emb) bf16

    # Pack `pack` tokens per output row so the output last dim is a multiple of
    # 128 lanes (unmasked stores).  pack == 1 when emb_size >= 128 or emb_size does
    # not divide 128 (e.g. 48/96: still correct, but falls back to masked stores).
    pack = (128 // emb_size) if (emb_size < 128 and 128 % emb_size == 0) else 1
    row_align = 8 * pack

    # Only pad up to the row alignment; the grid handles a partial last block, so
    # no padding/slicing pass proportional to block_t is needed.
    t_pad = _round_up(t, row_align)
    if t_pad != t:
        tok_flat = jnp.concatenate(
            [tok_flat, jnp.zeros((t_pad - t,), jnp.int32)], axis=0)
    tok2d = tok_flat.reshape((t_pad // pack, pack))

    # Tile size: as large as possible (amortize per-step overhead), aligned, <= t_pad.
    bt = max(min(block_t, t_pad), row_align)
    bt = min(_round_up(bt, row_align), t_pad)
    # v7x has 2 TensorCores; if a single step would cover a large t, split into >= 2.
    if bt >= t_pad and t_pad >= 512:
        bt = min(_round_up((t_pad + 1) // 2, row_align), t_pad)

    rows = bt // pack
    n_rows = t_pad // pack
    grid = (-(-n_rows // rows),)

    out_itemsize = jnp.dtype(pe_weight.dtype).itemsize
    cost = pl.CostEstimate(
        flops=2 * t_pad * (2 * max_len) * emb_size,
        transcendentals=0,
        bytes_accessed=t_pad * 4 + t_pad * emb_size * out_itemsize + table.size * 2,
    )

    out = pl.pallas_call(
        _embed_kernel,
        out_shape=jax.ShapeDtypeStruct((n_rows, pack * emb_size), pe_weight.dtype),
        grid=grid,
        in_specs=[
            # Token tile for this grid step.
            pl.BlockSpec((rows, pack), lambda i: (i, 0)),
            # Full stacked table, constant block index -> DMA'd from HBM once.
            # For very large tables (esp. v7x, 64 MiB VMEM): single-buffer it via
            # pipeline_mode=pl.Buffered(1), raise vmem_limit_bytes, or use an HBM
            # row-gather (scalar-prefetched tokens + per-row DMA) instead.
            pl.BlockSpec((2 * max_len, emb_size), lambda i: (0, 0)),
        ],
        out_specs=pl.BlockSpec((rows, pack * emb_size), lambda i: (i, 0)),
        compiler_params=pltpu.CompilerParams(
            dimension_semantics=("parallel",),   # independent tiles; both TCs on v7x
        ),
        cost_estimate=cost,
    )(tok2d, table)

    # (n_rows, pack*emb) is row-major identical to (t_pad, emb).
    out = out.reshape((t_pad, emb_size))
    if t_pad != t:
        out = out[:t]
    return out.reshape(orig_shape + (emb_size,))


if __name__ == "__main__":
    emb_size = 32
    max_len = 64

    key = jax.random.PRNGKey(0)
    k_w, k_tok = jax.random.split(key)

    # nn.Embedding default init: weight ~ N(0, 1), shape (maxLen, embSize).
    pe_weight = jax.random.normal(k_w, (max_len, emb_size), dtype=jnp.float32)

    # Non-continuous positions: arbitrary integer indices in [0, maxLen).
    tok = jax.random.randint(k_tok, (2, 8), 0, max_len, dtype=jnp.int32)

    out = jax.block_until_ready(positional_encoding_lookup(tok, pe_weight))

    # Reference: plain gather (== nn.Embedding forward).  The bf16 hi/lo
    # reconstruction is exact to ~2^-16 relative, hence the 1e-4 tolerances.
    ref = jnp.take(pe_weight, tok, axis=0)
    assert out.shape == (2, 8, emb_size)
    np.testing.assert_allclose(np.asarray(out), np.asarray(ref),
                               rtol=1e-4, atol=1e-4)

    print("KERNEL_OK")
</pallas_src>

<mosaic_0001>
module attributes {stable_mosaic.version = 11 : i64} {
  func.func @_embed_kernel(%arg0: i32, %arg1: memref<8x4xi32, #tpu.memory_space<vmem>>, %arg2: memref<128x32xbf16, #tpu.memory_space<vmem>>, %arg3: memref<8x128xf32, #tpu.memory_space<vmem>>) attributes {dimension_semantics = [#tpu.dimension_semantics<parallel>], iteration_bounds = array<i64: 1>, scalar_prefetch = 0 : i64, scratch_operands = 0 : i64, tpu.core_type = #tpu.core_type<tc>, window_params = [{transform_indices = @transform_0, window_bounds = array<i64: 8, 4>}, {pipeline_mode = #tpu.pipeline_mode<synchronous>, transform_indices = @transform_1, window_bounds = array<i64: 128, 32>}, {transform_indices = @transform_2, window_bounds = array<i64: 8, 128>}]} {
    %c0 = arith.constant 0 : index
    %c0_0 = arith.constant 0 : index
    %0 = vector.load %arg1[%c0, %c0_0] : memref<8x4xi32, #tpu.memory_space<vmem>>, vector<8x4xi32>
    %c0_1 = arith.constant 0 : index
    %c0_2 = arith.constant 0 : index
    %1 = vector.load %arg2[%c0_1, %c0_2] : memref<128x32xbf16, #tpu.memory_space<vmem>>, vector<128x32xbf16>
    %2 = tpu.iota {dimensions = array<i32: 1>} : vector<8x128xi32>
    %c64_i32 = arith.constant 64 : i32
    %3 = vector.broadcast %c64_i32 : i32 to vector<8x128xi32>
    %4 = arith.cmpi sge, %2, %3 : vector<8x128xi32>
    %c64_i32_3 = arith.constant 64 : i32
    %5 = vector.broadcast %c64_i32_3 : i32 to vector<8x128xi32>
    %6 = arith.subi %2, %5 : vector<8x128xi32>
    %7 = arith.select %4, %6, %2 : vector<8x128xi1>, vector<8x128xi32>
    %8 = vector.extract_strided_slice %0 {offsets = [0, 0], sizes = [8, 1], strides = [1, 1]} : vector<8x4xi32> to vector<8x1xi32>
    %9 = vector.broadcast %8 : vector<8x1xi32> to vector<8x128xi32>
    %10 = arith.cmpi eq, %7, %9 : vector<8x128xi32>
    %11 = arith.extui %10 : vector<8x128xi1> to vector<8x128xi32>
    %12 = arith.sitofp %11 : vector<8x128xi32> to vector<8x128xf32>
    %13 = arith.truncf %12 : vector<8x128xf32> to vector<8x128xbf16>
    %cst = arith.constant dense<0.000000e+00> : vector<8x32xf32>
    %14 = tpu.matmul %13, %1, %cst {dimension_numbers = #tpu.dot_dimension_numbers<[1], [0], [0], [1], [0, 0, 1, 1], [], []>} : vector<8x128xbf16>, vector<128x32xbf16>, vector<8x32xf32> -> vector<8x32xf32>
    %c0_4 = arith.constant 0 : index
    %c0_5 = arith.constant 0 : index
    %15 = vector.load %arg3[%c0_4, %c0_5] : memref<8x128xf32, #tpu.memory_space<vmem>>, vector<8x32xf32>
    tpu.vector_store %arg3[%c0_4, %c0_5], %14 {strides = array<i32>} : memref<8x128xf32, #tpu.memory_space<vmem>>, vector<8x32xf32>,
    %16 = vector.extract_strided_slice %0 {offsets = [0, 1], sizes = [8, 1], strides = [1, 1]} : vector<8x4xi32> to vector<8x1xi32>
    %17 = vector.broadcast %16 : vector<8x1xi32> to vector<8x128xi32>
    %18 = arith.cmpi eq, %7, %17 : vector<8x128xi32>
    %19 = arith.extui %18 : vector<8x128xi1> to vector<8x128xi32>
    %20 = arith.sitofp %19 : vector<8x128xi32> to vector<8x128xf32>
    %21 = arith.truncf %20 : vector<8x128xf32> to vector<8x128xbf16>
    %cst_6 = arith.constant dense<0.000000e+00> : vector<8x32xf32>
    %22 = tpu.matmul %21, %1, %cst_6 {dimension_numbers = #tpu.dot_dimension_numbers<[1], [0], [0], [1], [0, 0, 1, 1], [], []>} : vector<8x128xbf16>, vector<128x32xbf16>, vector<8x32xf32> -> vector<8x32xf32>
    %c0_7 = arith.constant 0 : index
    %c32 = arith.constant 32 : index
    %23 = vector.load %arg3[%c0_7, %c32] : memref<8x128xf32, #tpu.memory_space<vmem>>, vector<8x32xf32>
    tpu.vector_store %arg3[%c0_7, %c32], %22 {strides = array<i32>} : memref<8x128xf32, #tpu.memory_space<vmem>>, vector<8x32xf32>,
    %24 = vector.extract_strided_slice %0 {offsets = [0, 2], sizes = [8, 1], strides = [1, 1]} : vector<8x4xi32> to vector<8x1xi32>
    %25 = vector.broadcast %24 : vector<8x1xi32> to vector<8x128xi32>
    %26 = arith.cmpi eq, %7, %25 : vector<8x128xi32>
    %27 = arith.extui %26 : vector<8x128xi1> to vector<8x128xi32>
    %28 = arith.sitofp %27 : vector<8x128xi32> to vector<8x128xf32>
    %29 = arith.truncf %28 : vector<8x128xf32> to vector<8x128xbf16>
    %cst_8 = arith.constant dense<0.000000e+00> : vector<8x32xf32>
    %30 = tpu.matmul %29, %1, %cst_8 {dimension_numbers = #tpu.dot_dimension_numbers<[1], [0], [0], [1], [0, 0, 1, 1], [], []>} : vector<8x128xbf16>, vector<128x32xbf16>, vector<8x32xf32> -> vector<8x32xf32>
    %c0_9 = arith.constant 0 : index
    %c64 = arith.constant 64 : index
    %31 = vector.load %arg3[%c0_9, %c64] : memref<8x128xf32, #tpu.memory_space<vmem>>, vector<8x32xf32>
    tpu.vector_store %arg3[%c0_9, %c64], %30 {strides = array<i32>} : memref<8x128xf32, #tpu.memory_space<vmem>>, vector<8x32xf32>,
    %32 = vector.extract_strided_slice %0 {offsets = [0, 3], sizes = [8, 1], strides = [1, 1]} : vector<8x4xi32> to vector<8x1xi32>
    %33 = vector.broadcast %32 : vector<8x1xi32> to vector<8x128xi32>
    %34 = arith.cmpi eq, %7, %33 : vector<8x128xi32>
    %35 = arith.extui %34 : vector<8x128xi1> to vector<8x128xi32>
    %36 = arith.sitofp %35 : vector<8x128xi32> to vector<8x128xf32>
    %37 = arith.truncf %36 : vector<8x128xf32> to vector<8x128xbf16>
    %cst_10 = arith.constant dense<0.000000e+00> : vector<8x32xf32>
    %38 = tpu.matmul %37, %1, %cst_10 {dimension_numbers = #tpu.dot_dimension_numbers<[1], [0], [0], [1], [0, 0, 1, 1], [], []>} : vector<8x128xbf16>, vector<128x32xbf16>, vector<8x32xf32> -> vector<8x32xf32>
    %c0_11 = arith.constant 0 : index
    %c96 = arith.constant 96 : index
    %39 = vector.load %arg3[%c0_11, %c96] : memref<8x128xf32, #tpu.memory_space<vmem>>, vector<8x32xf32>
    tpu.vector_store %arg3[%c0_11, %c96], %38 {strides = array<i32>} : memref<8x128xf32, #tpu.memory_space<vmem>>, vector<8x32xf32>,
    return
  }
  func.func @transform_0(%arg0: i32) -> (i32, i32) {
    %c0_i32 = arith.constant 0 : i32
    %c0_i32_0 = arith.constant 0 : i32
    return %arg0, %c0_i32 : i32, i32
  }
  func.func @transform_1(%arg0: i32) -> (i32, i32) {
    %c0_i32 = arith.constant 0 : i32
    %c0_i32_0 = arith.constant 0 : i32
    %c0_i32_1 = arith.constant 0 : i32
    return %c0_i32, %c0_i32_0 : i32, i32
  }
  func.func @transform_2(%arg0: i32) -> (i32, i32) {
    %c0_i32 = arith.constant 0 : i32
    %c0_i32_0 = arith.constant 0 : i32
    return %arg0, %c0_i32 : i32, i32
  }
}

</mosaic_0001>

<bundles_post_ra>
// kernel: tpu_custom_call.1
= control target key start
LH: loop header
LB: loop body
LE: loop exit
PB: predicated region body
PF: predicated region fallthrough
CT: control target
= control target key end

     0   :  { %v490_v2 = vmov 0   ;;  %v491_v3 = vmov 2   ;;  %v492_v4 = vmov 0.0   ;;  %v493_v6 = vmov 1   ;;  %s613_s0 = inlined_call_operand.vmem [shape: s32[8,4], index: 0, kind: input, shape index: {}]   ;;  %s614_s1 = inlined_call_operand.vmem [shape: bf16[128,32], index: 1, kind: input, shape index: {}]   ;;  %s615_s2 = inlined_call_operand.hbm [shape: f32[8,128], index: 2, kind: output, shape index: {}]  }
   0x1   :  { %v13_v0 = vld [vmem:[%s613_s0] sm:$0xff]  ;;  %453 = vset.pattern.permute.xlu0 %v490_v2  ;;  %455 = vset.pattern.permute.xlu1 %v491_v3  ;;  %v530_v5 = vld [vmem:[%s614_s1 + $0x8] sm:$0xff]   ;;  %v494_v7 = vmov 3   ;;  %v539_v8 = vld [vmem:[%s614_s1 + $0x10] sm:$0xff]  }
   0x2   :  { %v522_v1 = vld [vmem:[%s614_s1] sm:$0xff]   ;;  %36 = vperm.xlu0 %453, %v13_v0   ;;  %186 = vperm.xlu1 %455, %v13_v0  }
   0x3   :  { %362 = vmatprep.subr.bf16.mxu0 %v492_v4  ;;  %382 = vmatprep.subr.bf16.mxu1 %v492_v4 }
   0x4   :  { %363 = vmatpush3.bf16.msra.mxu0 %v522_v1  ;;  %383 = vmatpush3.bf16.msra.mxu1 %v522_v1 }
   0x5   :  { %364 = vmatprep.subr.bf16.mxu0 %v492_v4  ;;  %384 = vmatprep.subr.bf16.mxu1 %v492_v4 }
   0x6   :  { %454 = vset.pattern.permute.xlu0 %v493_v6  ;;  %456 = vset.pattern.permute.xlu1 %v494_v7 }
   0x7   :  { %133 = vperm.xlu0 %454, %v13_v0   ;;  %239 = vperm.xlu1 %456, %v13_v0  }
   0x8   :  { %365 = vmatpush3.bf16.msra.mxu0 %v530_v5  ;;  %385 = vmatpush3.bf16.msra.mxu1 %v530_v5 }
   0x9   :  { %366 = vmatprep.subr.bf16.mxu0 %v492_v4  ;;  %386 = vmatprep.subr.bf16.mxu1 %v492_v4 }
   0xa   :  { %7 = vsyncpa [#allocation3], 0  ;;  %vm495_vm0 = vmmov 0   ;;  %v461_v9 = vld [vmem:[%s614_s1 + $0x18] sm:$0xff]   ;;  %v462_v10 = vld [vmem:[%s614_s1 + $0x20] sm:$0xff]   ;;  %v30_v14 = vlaneseq  ;;  %vm130_vm10 = vcmask 261120  }
   0xb   :  { %378 = vmatprep.mubr.msk.bf16.mxu0 %vm495_vm0, %v492_v4  ;;  %398 = vmatprep.mubr.msk.bf16.mxu1 %vm495_vm0, %v492_v4  ;;  %v463_v11 = vld [vmem:[%s614_s1 + $0x28] sm:$0xff]   ;;  %v464_v12 = vld [vmem:[%s614_s1 + $0x30] sm:$0xff]   ;;  %v465_v13 = vld [vmem:[%s614_s1 + $0x38] sm:$0xff]   ;;  %v496_v19 = vmov 1.0|1.0   ;;  %s497_s1 = smov 32  }
   0xc   :  { %457 = vset.pattern.permute.xlu0 %v494_v7  ;;  %367 = vmatpush3.bf16.msra.mxu0 %v539_v8  ;;  %v31_v15 = vand.u32 127, %v30_v14  ;;  %s498_s26 = smov 64   ;;  %s499_s27 = smov 96   ;;  %vm183_vm11 = vcmask 523520   ;;  %vm236_vm12 = vcmask 785920   ;;  %vm289_vm13 = vcmask 1048320  }
   0xd   :  { %387 = vmatpush3.bf16.msra.mxu1 %v539_v8  ;;  %368 = vmatprep.subr.bf16.mxu0 %v492_v4  ;;  %s500_s28 = smov [#allocation2]  }
   0xe   :  { %388 = vmatprep.subr.bf16.mxu1 %v492_v4  ;;  %v305_v16 = vadd.s32 4294967232, %v31_v15  ;;  %vm32_vm1 = vcmp.ge.s32.totalorder %v31_v15, 64  ;;  %s297_s29 = sshll.u32 %s500_s28, 4  ;;  %s298_s29 = int_to_ptr.vmem [resolvable:$true] %s297_s29 }
   0xf   :  { %s466_s30 = scalar_lea.vmem %s298_s29, 128  ;;  %p471_p1 = scmp.lt.s32.totalorder %s298_s29, %s298_s29 }
  0x10   :  { %369 = vmatpush3.bf16.msra.mxu0 %v461_v9  ;;  %v34_v17 = vsel %vm32_vm1, %v305_v16, %v31_v15  ;;  %p467_p0 = scmp.ne.s32.totalorder %s298_s29, %s466_s30  ;;  %p472_p2 = scmp.lt.s32.totalorder %s466_s30, %s466_s30 }
  0x11   :  { %389 = vmatpush3.bf16.msra.mxu1 %v461_v9  ;;  %370 = vmatprep.subr.bf16.mxu0 %v492_v4 }
  0x12   :  { %390 = vmatprep.subr.bf16.mxu1 %v492_v4  ;;  %p473_p3 = por %p472_p2, %p471_p1 }
  0x14   :  { %371 = vmatpush3.bf16.msra.mxu0 %v462_v10  ;;  %p474_p4 = pnand %p473_p3, %p467_p0 }
  0x15   :  { %391 = vmatpush3.bf16.msra.mxu1 %v462_v10  ;;  %372 = vmatprep.subr.bf16.mxu0 %v492_v4 }
  0x16   :  { %392 = vmatprep.subr.bf16.mxu1 %v492_v4 }
  0x18   :  { %373 = vmatpush3.bf16.msra.mxu0 %v463_v11 }
  0x19   :  { %393 = vmatpush3.bf16.msra.mxu1 %v463_v11  ;;  %374 = vmatprep.subr.bf16.mxu0 %v492_v4 }
  0x1a   :  { %394 = vmatprep.subr.bf16.mxu1 %v492_v4 }
  0x1c   :  { %375 = vmatpush3.bf16.msra.mxu0 %v464_v12 }
  0x1d   :  { %395 = vmatpush3.bf16.msra.mxu1 %v464_v12  ;;  %376 = vmatprep.subr.bf16.mxu0 %v492_v4 }
  0x1e   :  { %396 = vmatprep.subr.bf16.mxu1 %v492_v4 }
  0x20   :  { %377 = vmatpush3.bf16.msra.mxu0 %v465_v13 }
  0x21   :  { %397 = vmatpush3.bf16.msra.mxu1 %v465_v13  ;;  %402 = vmatprep.subr.bf16.mxu0 %v492_v4 }
  0x22   :  { %422 = vmatprep.subr.bf16.mxu1 %v492_v4 }
  0x81   :  { %v37_v18 = vpop.permute.xlu0 %36  ;;  %v187_v21 = vpop.permute.xlu1 %186 }
  0x82   :  { %vm38_vm2 = vcmp.eq.s32.totalorder %v34_v17, %v37_v18  ;;  %vm188_vm6 = vcmp.eq.s32.totalorder %v34_v17, %v187_v21 }
  0x83   :  { %vm315_vm3 = vmpackc.low %vm38_vm2, %vm38_vm2 }
  0x84   :  { %379 = vmatmul.mubr.msk.bf16.vlgmr.msra.gmra.mrb[0].mxu0 %vm315_vm3, %v496_v19  ;;  %vm321_vm7 = vmpackc.low %vm188_vm6, %vm188_vm6 }
  0x85   :  { %403 = vmatpush3.bf16.msra.mxu0 %v522_v1  ;;  %418 = vmatprep.mubr.msk.bf16.mxu0 %vm495_vm0, %v492_v4 }
  0x86   :  { %v134_v20 = vpop.permute.xlu0 %133  ;;  %404 = vmatprep.subr.bf16.mxu0 %v492_v4  ;;  %v240_v22 = vpop.permute.xlu1 %239 }
  0x87   :  { %vm135_vm4 = vcmp.eq.s32.totalorder %v34_v17, %v134_v20  ;;  %vm241_vm8 = vcmp.eq.s32.totalorder %v34_v17, %v240_v22 }
  0x88   :  { %vm318_vm5 = vmpackc.low %vm135_vm4, %vm135_vm4 }
  0x89   :  { %405 = vmatpush3.bf16.msra.mxu0 %v530_v5  ;;  %399 = vmatmul.mubr.msk.bf16.vlgmr.msra.gmra.mrb[0].mxu1 %vm318_vm5, %v496_v19  ;;  %vm324_vm9 = vmpackc.low %vm241_vm8, %vm241_vm8 }
  0x8a   :  { %423 = vmatpush3.bf16.msra.mxu1 %v522_v1  ;;  %406 = vmatprep.subr.bf16.mxu0 %v492_v4 }
  0x8b   :  { %424 = vmatprep.subr.bf16.mxu1 %v492_v4  ;;  %438 = vmatprep.mubr.msk.bf16.mxu1 %vm495_vm0, %v492_v4 }
  0x8d   :  { %407 = vmatpush3.bf16.msra.mxu0 %v539_v8 }
  0x8e   :  { %425 = vmatpush3.bf16.msra.mxu1 %v530_v5  ;;  %408 = vmatprep.subr.bf16.mxu0 %v492_v4 }
  0x8f   :  { %426 = vmatprep.subr.bf16.mxu1 %v492_v4 }
  0x91   :  { %409 = vmatpush3.bf16.msra.mxu0 %v461_v9 }
  0x92   :  { %427 = vmatpush3.bf16.msra.mxu1 %v539_v8  ;;  %410 = vmatprep.subr.bf16.mxu0 %v492_v4 }
  0x93   :  { %428 = vmatprep.subr.bf16.mxu1 %v492_v4 }
  0x95   :  { %411 = vmatpush3.bf16.msra.mxu0 %v462_v10 }
  0x96   :  { %429 = vmatpush3.bf16.msra.mxu1 %v461_v9  ;;  %412 = vmatprep.subr.bf16.mxu0 %v492_v4 }
  0x97   :  { %430 = vmatprep.subr.bf16.mxu1 %v492_v4 }
  0x99   :  { %413 = vmatpush3.bf16.msra.mxu0 %v463_v11 }
  0x9a   :  { %431 = vmatpush3.bf16.msra.mxu1 %v462_v10  ;;  %414 = vmatprep.subr.bf16.mxu0 %v492_v4 }
  0x9b   :  { %432 = vmatprep.subr.bf16.mxu1 %v492_v4 }
  0x9d   :  { %415 = vmatpush3.bf16.msra.mxu0 %v464_v12 }
  0x9e   :  { %433 = vmatpush3.bf16.msra.mxu1 %v463_v11  ;;  %416 = vmatprep.subr.bf16.mxu0 %v492_v4 }
  0x9f   :  { %434 = vmatprep.subr.bf16.mxu1 %v492_v4 }
  0xa1   :  { %417 = vmatpush3.bf16.msra.mxu0 %v465_v13 }
  0xa2   :  { %435 = vmatpush3.bf16.msra.mxu1 %v464_v12 }
  0xa3   :  { %436 = vmatprep.subr.bf16.mxu1 %v492_v4 }
  0xa4   :  { %419 = vmatmul.mubr.msk.bf16.vlgmr.msra.gmra.mrb[4].mxu0 %vm321_vm7, %v496_v19 }
  0xa6   :  { %437 = vmatpush3.bf16.msra.mxu1 %v465_v13 }
  0xa9   :  { %439 = vmatmul.mubr.msk.bf16.vlgmr.msra.gmra.mrb[4].mxu1 %vm324_vm9, %v496_v19 }
 0x157   :  { %v124_v23 = vpop.f32.mrb[0].mxu0 }
 0x158   :  { %131 = vst.msk [vmem:[#allocation2] sm:$0xff] %vm130_vm10, %v124_v23  ;;  %v380_v24 = vpop.f32.mrb[1].mxu0 }
 0x159   :  { %v127_v25 = vpop.f32.mrb[2].mxu0 }
 0x15a   :  { %v381_v26 = vpop.f32.mrb[3].mxu0 }
 0x15c   :  { %v173_v27 = vpop.f32.mrb[0].mxu1 }
 0x15d   :  { %180 = vrot.lane.b32.xlu1 %v173_v27, %s497_s1  ;;  %v400_v28 = vpop.f32.mrb[1].mxu1 }
 0x15e   :  { %v176_v29 = vpop.f32.mrb[2].mxu1 }
 0x15f   :  { %v401_v30 = vpop.f32.mrb[3].mxu1 }
 0x177   :  { %v226_v31 = vpop.f32.mrb[4].mxu0 }
 0x178   :  { %233 = vrot.lane.b32.xlu0 %v226_v31, %s498_s26  ;;  %v420_v32 = vpop.f32.mrb[5].mxu0 }
 0x179   :  { %v229_v33 = vpop.f32.mrb[6].mxu0 }
 0x17a   :  { %v421_v34 = vpop.f32.mrb[7].mxu0 }
 0x17c   :  { %v279_v35 = vpop.f32.mrb[4].mxu1 }
 0x17d   :  { %286 = vrot.lane.b32.xlu1 %v279_v35, %s499_s27  ;;  %v440_v36 = vpop.f32.mrb[5].mxu1 }
 0x17e   :  { %v282_v37 = vpop.f32.mrb[6].mxu1 }
 0x17f   :  { %v441_v38 = vpop.f32.mrb[7].mxu1 }
 0x1cf   :  { %v181_v39 = vpop.permute.xlu1 %180 }
 0x1d0   :  { %184 = vst.msk [vmem:[#allocation2] sm:$0xff] %vm183_vm11, %v181_v39 }
 0x1ea   :  { %v234_v40 = vpop.permute.xlu0 %233 }
 0x1eb   :  { %237 = vst.msk [vmem:[#allocation2] sm:$0xff] %vm236_vm12, %v234_v40 }
 0x1ef   :  { %v287_v41 = vpop.permute.xlu1 %286 }
 0x1f0   :  { %290 = vst.msk [vmem:[#allocation2] sm:$0xff] %vm289_vm13, %v287_v41 }
 0x1f1   :  { %477 = shalt.err (!%p474_p4)
}
 0x1f2   :  { %s478_s5 = scalar_lea.hbm %s615_s2, 128 }
 0x1f3   :  { %p479_p5 = scmp.ne.s32.totalorder %s615_s2, %s478_s5  ;;  %p482_p6 = scmp.lt.u32.totalorder %s478_s5, %s615_s2 }
 0x1f5   :  { %p484_p7 = pnand %p482_p6, %p479_p5 }
 0x1f7   :  { %487 = shalt.err (!%p484_p7)
}
 0x1f8   :  { %300 = dma.vmem_to_hbm [thread:$0]  %s298_s29, 128, %s615_s2, [#allocation3]  }
 0x1f9   :  { %488 = dma.done.wait [#allocation3], 128  }
 0x1fa   :  { %489 = vsyncadd [#allocation3], 4294967168 }
 0x1fb   :  { %304 = vsyncpa [#allocation3], 1 }

</bundles_post_ra>
